<compile_context>
chip_gen: v5e
topology: v5e:2x2
jax: 0.10.0
libtpu: 0.0.40
codegen_flags: <defaults>
</compile_context>

<pallas_src>
import jax
import jax.numpy as jnp
from jax.experimental import pallas as pl
from jax.experimental.pallas import tpu as pltpu

_SUBLANE = 8
_LANE = 128

# Gridless (no pipeline) only where launch fixed cost dominates anyway.
_SINGLE_TILE_BYTES = 192 * 1024
# Tiled-path block budget: double-buffered in+out ~= 4x block bytes, so 2 MiB
# blocks -> ~8 MiB resident, under v5e's 16 MiB scoped-VMEM default.
_MAX_BLOCK_BYTES = 2 * 1024 * 1024
# 512 KiB blocks already reach ~85% of HBM roofline (measured on v6e).
_MIN_BLOCK_BYTES = 512 * 1024


def _scale_kernel(p_ref, x_ref, o_ref):
    # p_ref: SMEM scalar parameter (shape (1,)); x_ref/o_ref: VMEM tiles.
    o_ref[...] = x_ref[...] * p_ref[0]


def _scale_2d(x2d: jax.Array, param: jax.Array) -> jax.Array:
    rows, cols = x2d.shape
    itemsize = x2d.dtype.itemsize
    total_bytes = rows * cols * itemsize
    out_shape = jax.ShapeDtypeStruct((rows, cols), x2d.dtype)

    if total_bytes <= _SINGLE_TILE_BYTES:
        # Gridless: whole slab as one VMEM block; no grid bookkeeping, no
        # pipeline prologue/epilogue.  At the 8 KiB test shape the Pallas
        # launch fixed cost dominates regardless; fusing `x * param` into the
        # surrounding XLA graph would be the only real win, but the spec asks
        # for a Pallas implementation, so this is the best Pallas-only path.
        return pl.pallas_call(
            _scale_kernel,
            out_shape=out_shape,
            in_specs=[
                pl.BlockSpec(memory_space=pltpu.MemorySpace.SMEM),  # param
                pl.BlockSpec(memory_space=pltpu.MemorySpace.VMEM),  # full slab
            ],
            out_specs=pl.BlockSpec(memory_space=pltpu.MemorySpace.VMEM),
        )(param, x2d)

    row_bytes = cols * itemsize

    if _SUBLANE * row_bytes > _MAX_BLOCK_BYTES:
        # Very wide rows: tile the lane dim too (2-D grid) so double-buffered
        # in+out can never blow past v7x's 64 MiB VMEM, whatever the aspect
        # ratio.  (Unreachable via mock_model_forward's slabs, kept for
        # direct callers.)
        block_cols = max(
            _LANE,
            (_MAX_BLOCK_BYTES // (_SUBLANE * itemsize)) // _LANE * _LANE,
        )
        block_cols = min(block_cols, cols)
        block_rows = min(_SUBLANE, rows)
        grid = (pl.cdiv(rows, block_rows), pl.cdiv(cols, block_cols))
        return pl.pallas_call(
            _scale_kernel,
            out_shape=out_shape,
            grid=grid,
            in_specs=[
                pl.BlockSpec(memory_space=pltpu.MemorySpace.SMEM),
                pl.BlockSpec((block_rows, block_cols), lambda i, j: (i, j)),
            ],
            out_specs=pl.BlockSpec((block_rows, block_cols), lambda i, j: (i, j)),
            compiler_params=pltpu.CompilerParams(
                dimension_semantics=("parallel", "parallel"),
            ),
        )(param, x2d)

    # Row-tiled path: aim for >=4 grid steps so the double-buffered pipeline
    # actually overlaps DMA with compute, blocks in the 512 KiB..2 MiB band.
    target_block_bytes = max(
        _MIN_BLOCK_BYTES, min(_MAX_BLOCK_BYTES, total_bytes // 4)
    )
    block_rows = max(
        _SUBLANE, (target_block_bytes // row_bytes) // _SUBLANE * _SUBLANE
    )
    block_rows = min(block_rows, rows)
    grid = (pl.cdiv(rows, block_rows),)
    # NOTE: a ragged last block reads past the logical array (garbage rows);
    # harmless for this elementwise op — do NOT copy this pattern into a
    # reduction kernel.
    return pl.pallas_call(
        _scale_kernel,
        out_shape=out_shape,
        grid=grid,
        in_specs=[
            pl.BlockSpec(memory_space=pltpu.MemorySpace.SMEM),     # param
            pl.BlockSpec((block_rows, cols), lambda i: (i, 0)),    # row tile
        ],
        out_specs=pl.BlockSpec((block_rows, cols), lambda i: (i, 0)),
        compiler_params=pltpu.CompilerParams(
            # Elementwise, rows independent -> shard across the 2 TCs (v7x).
            dimension_semantics=("parallel",),
        ),
    )(param, x2d)


def _slab_cols(n: int) -> int:
    """Largest lane-dense width in {512, 256, 128} that divides n, else 0."""
    for cols in (512, 256, 128):
        if n % cols == 0:
            return cols
    return 0


@jax.jit
def mock_model_forward(x: jax.Array, param: jax.Array) -> jax.Array:
    """Pallas implementation of MockModel.forward == stub_forward(x) = x * param."""
    orig_shape = x.shape
    n = x.size
    flat = x.reshape(-1)

    cols = _slab_cols(n)
    padded_n = n
    if cols == 0:
        # Generic fallback: pad the tail so the lane width is a full multiple
        # of 128 -> unmasked full-width stores.  Test shape never takes this.
        cols = 512 if n >= 512 else _LANE
        padded_n = pl.cdiv(n, cols) * cols
        flat = jnp.pad(flat, (0, padded_n - n))

    x2d = flat.reshape(padded_n // cols, cols)
    out2d = _scale_2d(x2d, param)

    out_flat = out2d.reshape(-1)
    if padded_n != n:
        out_flat = out_flat[:n]
    return out_flat.reshape(orig_shape)


if __name__ == "__main__":
    key = jax.random.PRNGKey(0)

    # Deterministic parameter init matching torch.nn.Parameter(torch.ones([1])).
    param = jnp.ones((1,), dtype=jnp.float32)

    # Small example input in NCHW: [2, 4, 16, 16].
    x = jax.random.normal(key, (2, 4, 16, 16), dtype=jnp.float32)

    # Reference (pure JAX).
    ref = x * param[0]

    out = mock_model_forward(x, param)
    out = jax.block_until_ready(out)

    assert out.shape == x.shape and out.dtype == x.dtype
    assert jnp.allclose(out, ref, atol=1e-6, rtol=1e-6)

    print("KERNEL_OK")
</pallas_src>

<mosaic_0001>
module attributes {stable_mosaic.version = 11 : i64} {
  func.func @_scale_kernel(%arg0: memref<1xf32, #tpu.memory_space<smem>>, %arg1: memref<4x512xf32, #tpu.memory_space<vmem>>, %arg2: memref<4x512xf32, #tpu.memory_space<vmem>>) attributes {dimension_semantics = [], scalar_prefetch = 0 : i64, scratch_operands = 0 : i64, tpu.core_type = #tpu.core_type<tc>} {
    %c0 = arith.constant 0 : index
    %c0_0 = arith.constant 0 : index
    %0 = vector.load %arg1[%c0, %c0_0] : memref<4x512xf32, #tpu.memory_space<vmem>>, vector<4x512xf32>
    %c0_1 = arith.constant 0 : index
    %1 = memref.load %arg0[%c0_1] : memref<1xf32, #tpu.memory_space<smem>>
    %2 = vector.broadcast %1 : f32 to vector<4x512xf32>
    %3 = arith.mulf %0, %2 : vector<4x512xf32>
    %c0_2 = arith.constant 0 : index
    %c0_3 = arith.constant 0 : index
    %4 = vector.load %arg2[%c0_2, %c0_3] : memref<4x512xf32, #tpu.memory_space<vmem>>, vector<4x512xf32>
    tpu.vector_store %arg2[%c0_2, %c0_3], %3 {strides = array<i32>} : memref<4x512xf32, #tpu.memory_space<vmem>>, vector<4x512xf32>,
    return
  }
}

</mosaic_0001>

<bundles_post_ra>
// kernel: mock_model_forward.1
= control target key start
LH: loop header
LB: loop body
LE: loop exit
PB: predicated region body
PF: predicated region fallthrough
CT: control target
= control target key end

     0   :  { %s54_s0 = inlined_call_operand.<no memory space> [shape: f32[1], index: 0, kind: input, shape index: {}]   ;;  %s55_s1 = inlined_call_operand.vmem [shape: f32[4,512], index: 1, kind: input, shape index: {}]   ;;  %s56_s2 = inlined_call_operand.vmem [shape: f32[4,512], index: 2, kind: output, shape index: {}]  }
   0x1   :  { %v12_v0 = vld [vmem:[%s55_s1] sm:$0xff]  ;;  %v15_v1 = vstv %s54_s0  ;;  %v13_v2 = vld [vmem:[%s55_s1 + $0x8] sm:$0xff] }
   0x2   :  { %v16_v3 = vmul.f32 %v15_v1, %v12_v0  ;;  %v17_v4 = vmul.f32 %v15_v1, %v13_v2 }
   0x4   :  { %18 = vst [vmem:[%s56_s2] sm:$0xff] %v16_v3 }
   0x5   :  { %19 = vst [vmem:[%s56_s2 + $0x8] sm:$0xff] %v17_v4 }

</bundles_post_ra>
